<compile_context>
chip_gen: v7x
topology: tpu7x:2x2x1
jax: 0.10.0
libtpu: 0.0.40
codegen_flags: <defaults>
</compile_context>

<pallas_src>
import functools
import math

import jax
import jax.numpy as jnp
from jax import lax
from jax.experimental import pallas as pl
from jax.experimental.pallas import tpu as pltpu

_LANE = 128
_SUBL = 8
_MIN_TOTAL_STEPS = 8          # target minimum grid steps so pipelining engages


@functools.lru_cache(maxsize=None)
def _hw_budget():
    """(max_block_rows, vmem_limit_bytes), generation-conditional."""
    try:
        vmem = int(pltpu.get_tpu_info().vmem_capacity_bytes)
    except Exception:
        vmem = 64 * 1024 * 1024
    if vmem >= 100 * 1024 * 1024:        # v5e / v6e: 128 MiB physical VMEM
        return 2048, 64 * 1024 * 1024
    return 1024, 48 * 1024 * 1024        # v7x: 64 MiB physical VMEM


def _round_up(x, m):
    return -(-x // m) * m


def _plan_rows(n_elems, batch):
    """Per (batch, plane) tiling plan.

    Returns (rows, r_blk, n_rblk, pad_elems, needs_row_mask) where `rows` is
    the number of 128-lane rows per plane, `r_blk` the rows per grid step,
    `pad_elems` the (rare) flat zero-pad needed to reach a lane multiple, and
    `needs_row_mask` whether the last row-block must be masked in-kernel.
    """
    max_rows, _ = _hw_budget()
    pad = _round_up(n_elems, _LANE) - n_elems      # 0 unless H*W % 128 != 0
    rows = (n_elems + pad) // _LANE

    if rows <= _SUBL:
        # Tiny map: a single full-extent block per batch (block dim == array
        # dim satisfies the (8,128) rule); no tail, no mask.
        return rows, rows, 1, pad, False

    # Enough blocks that B * n_rblk >= _MIN_TOTAL_STEPS (subject to the 8-row
    # granularity), but each block as large as the VMEM budget allows.
    min_blocks = max(1, -(-_MIN_TOTAL_STEPS // batch))
    r_blk = _round_up(-(-rows // min_blocks), _SUBL)
    r_blk = min(r_blk, max_rows, (rows // _SUBL) * _SUBL)
    n_rblk = -(-rows // r_blk)
    needs_mask = (rows % r_blk) != 0
    return rows, r_blk, n_rblk, pad, needs_mask


def _make_det_kernel(rows_total, r_blk, needs_mask):
    """One (batch, row-block) tile -> (8,128) partial sums (rows 5..7 zero)."""

    def kernel(gt_s_ref, pred_s_ref, ign_ref, gt_g_ref, pred_g_ref, out_ref):
        f32 = jnp.float32
        gt = gt_s_ref[...].astype(f32)        # (r_blk, 128)
        pred = pred_s_ref[...].astype(f32)    # (r_blk, 128)
        ign = ign_ref[...].astype(f32)        # (r_blk, 128) binary (.byte() mask)
        pred_m = pred * (1.0 - ign)

        # geo channels: d1, d2, d3, d4, angle  (refs are (5, r_blk, 128))
        d1g = gt_g_ref[0].astype(f32)
        d2g = gt_g_ref[1].astype(f32)
        d3g = gt_g_ref[2].astype(f32)
        d4g = gt_g_ref[3].astype(f32)
        ag = gt_g_ref[4].astype(f32)
        d1p = pred_g_ref[0].astype(f32)
        d2p = pred_g_ref[1].astype(f32)
        d3p = pred_g_ref[2].astype(f32)
        d4p = pred_g_ref[3].astype(f32)
        ap = pred_g_ref[4].astype(f32)

        area_gt = (d1g + d2g) * (d3g + d4g)
        area_pred = (d1p + d2p) * (d3p + d4p)
        w_union = jnp.minimum(d3g, d3p) + jnp.minimum(d4g, d4p)
        h_union = jnp.minimum(d1g, d1p) + jnp.minimum(d2g, d2p)
        area_intersect = w_union * h_union
        area_union = area_gt - area_intersect + area_pred
        # -log((i+1)/(u+1)) == log(u+1) - log(i+1)  (no divide)
        iou_loss_map = jnp.log(area_union + 1.0) - jnp.log(area_intersect + 1.0)
        angle_loss_map = 1.0 - jnp.cos(ap - ag)

        if needs_mask:
            # Last row-block extends past `rows_total`; OOB rows hold undefined
            # data, so select (not multiply) to be NaN/Inf safe.
            ri = pl.program_id(1)
            gidx = ri * r_blk + lax.broadcasted_iota(
                jnp.int32, (r_blk, _LANE), 0)
            valid = gidx < rows_total

            def m(x):
                return jnp.where(valid, x, 0.0)
        else:
            def m(x):
                return x

        # Single tile-aligned (8,128) store (rows 5..7 are zero filler).
        out_ref[...] = jnp.concatenate(
            [
                jnp.sum(m(gt), axis=0, keepdims=True),
                jnp.sum(m(gt * pred_m), axis=0, keepdims=True),
                jnp.sum(m(pred_m), axis=0, keepdims=True),
                jnp.sum(m(iou_loss_map * gt), axis=0, keepdims=True),
                jnp.sum(m(angle_loss_map * gt), axis=0, keepdims=True),
                jnp.zeros((3, _LANE), f32),
            ],
            axis=0,
        )

    return kernel


def _to_score_slab(x, rows, pad):
    """(B,1,H,W) -> (B, rows, 128). Free reshape; zero-pad only if H*W%128!=0."""
    b = x.shape[0]
    flat = x.reshape(b, -1)
    if pad:
        flat = jnp.pad(flat, ((0, 0), (0, pad)))   # rare fallback; zeros are neutral
    return flat.reshape(b, rows, _LANE)


def _to_geo_slab(x, rows, pad):
    """(B,5,H,W) -> (B, 5, rows, 128). Free reshape; zero-pad only if needed."""
    b = x.shape[0]
    flat = x.reshape(b, 5, -1)
    if pad:
        flat = jnp.pad(flat, ((0, 0), (0, 0), (0, pad)))
    return flat.reshape(b, 5, rows, _LANE)


def _detection_sums(gt_score, pred_score, gt_geo, pred_geo, ignored_map):
    b = gt_score.shape[0]
    n = math.prod(gt_score.shape[1:])          # 1 * H * W
    rows, r_blk, n_rblk, pad, needs_mask = _plan_rows(n, b)
    _, vmem_limit = _hw_budget()

    gs = _to_score_slab(gt_score, rows, pad)
    ps = _to_score_slab(pred_score, rows, pad)
    ig = _to_score_slab(ignored_map, rows, pad)
    gg = _to_geo_slab(gt_geo, rows, pad)
    pg = _to_geo_slab(pred_geo, rows, pad)

    # NOTE: the three score-like maps are deliberately NOT pre-stacked into one
    # slab: doing so would add an HBM round trip in the wrapper (this kernel is
    # bandwidth bound), which outweighs the saved DMA descriptors.
    score_spec = pl.BlockSpec((None, r_blk, _LANE), lambda bi, ri: (bi, ri, 0))
    geo_spec = pl.BlockSpec((None, 5, r_blk, _LANE),
                            lambda bi, ri: (bi, 0, ri, 0))
    out_spec = pl.BlockSpec((None, None, _SUBL, _LANE),
                            lambda bi, ri: (bi, ri, 0, 0))

    partials = pl.pallas_call(
        _make_det_kernel(rows, r_blk, needs_mask),
        out_shape=jax.ShapeDtypeStruct((b, n_rblk, _SUBL, _LANE), jnp.float32),
        grid=(b, n_rblk),
        in_specs=[score_spec, score_spec, score_spec, geo_spec, geo_spec],
        out_specs=out_spec,
        compiler_params=pltpu.CompilerParams(
            dimension_semantics=("parallel", "parallel"),
            vmem_limit_bytes=vmem_limit,
        ),
    )(gs, ps, ig, gg, pg)

    sums = jnp.sum(partials, axis=(0, 1, 3))   # (8,); rows 5..7 are zeros
    return sums[0], sums[1], sums[2], sums[3], sums[4]


@functools.partial(jax.jit, static_argnames=("weight_angle",))
def _detection_losses(gt_score, pred_score, gt_geo, pred_geo, ignored_map,
                      *, weight_angle):
    s_gt, s_inter, s_pred, s_iou, s_ang = _detection_sums(
        gt_score, pred_score, gt_geo, pred_geo, ignored_map)

    empty = s_gt < 1.0                       # "if torch.sum(gt_score) < 1"
    safe_gt = jnp.where(empty, 1.0, s_gt)    # avoids NaN grads through where

    union = s_gt + s_pred + 1e-5
    cls_loss = 1.0 - 2.0 * s_inter / union
    angle_loss = s_ang / safe_gt
    iou_loss = s_iou / safe_gt
    geo_loss = weight_angle * angle_loss + iou_loss

    # Empty-gt branch of the original module returns zeros.
    reg_loss = jnp.where(empty, 0.0, geo_loss)
    cls_loss = jnp.where(empty, 0.0, cls_loss)
    angle_loss = jnp.where(empty, 0.0, angle_loss)
    recog_loss = jnp.float32(0.0)
    return dict(reg_loss=reg_loss, cls_loss=cls_loss,
                recog_loss=recog_loss, angle_loss=angle_loss)


def fots_loss(y_true_cls, y_pred_cls, y_true_geo, y_pred_geo,
              y_true_recog, y_pred_recog, training_mask,
              mode="detection", weight_angle=10.0):
    if mode != "detection":
        # TODO(synk): CTCLoss (recognition / united modes) has no clean Pallas
        # equivalent; only the detection branch is implemented here.
        raise NotImplementedError("only 'detection' mode is implemented")
    return _detection_losses(y_true_cls, y_pred_cls, y_true_geo, y_pred_geo,
                             training_mask, weight_angle=float(weight_angle))


def _reference(y_true_cls, y_pred_cls, y_true_geo, y_pred_geo, training_mask,
               weight_angle=10.0):
    """Pure-JAX mirror of the PyTorch DetectionLoss for verification."""
    pred_m = y_pred_cls * (1.0 - training_mask)
    inter = jnp.sum(y_true_cls * pred_m)
    union = jnp.sum(y_true_cls) + jnp.sum(pred_m) + 1e-5
    cls_loss = 1.0 - 2.0 * inter / union
    d1g, d2g, d3g, d4g, ag = jnp.split(y_true_geo, 5, axis=1)
    d1p, d2p, d3p, d4p, ap = jnp.split(y_pred_geo, 5, axis=1)
    area_gt = (d1g + d2g) * (d3g + d4g)
    area_pred = (d1p + d2p) * (d3p + d4p)
    w_union = jnp.minimum(d3g, d3p) + jnp.minimum(d4g, d4p)
    h_union = jnp.minimum(d1g, d1p) + jnp.minimum(d2g, d2p)
    area_int = w_union * h_union
    area_un = area_gt - area_int + area_pred
    iou_map = -jnp.log((area_int + 1.0) / (area_un + 1.0))
    ang_map = 1.0 - jnp.cos(ap - ag)
    sg = jnp.sum(y_true_cls)
    angle_loss = jnp.sum(ang_map * y_true_cls) / sg
    iou_loss = jnp.sum(iou_map * y_true_cls) / sg
    return weight_angle * angle_loss + iou_loss, cls_loss, angle_loss


if __name__ == "__main__":
    key = jax.random.PRNGKey(0)
    B, H, W = 2, 16, 16
    k1, k2, k3, k4, k5 = jax.random.split(key, 5)

    y_true_cls = (jax.random.uniform(k1, (B, 1, H, W)) > 0.5).astype(jnp.float32)
    y_pred_cls = jax.nn.sigmoid(jax.random.normal(k2, (B, 1, H, W)))
    y_true_geo = jnp.abs(jax.random.normal(k3, (B, 5, H, W))) * 4.0
    y_pred_geo = jnp.abs(jax.random.normal(k4, (B, 5, H, W))) * 4.0
    training_mask = (jax.random.uniform(k5, (B, 1, H, W)) > 0.8).astype(jnp.float32)

    out = fots_loss(y_true_cls, y_pred_cls, y_true_geo, y_pred_geo,
                    None, None, training_mask, mode="detection")
    out = {k: jax.block_until_ready(v) for k, v in out.items()}

    reg_ref, cls_ref, ang_ref = _reference(
        y_true_cls, y_pred_cls, y_true_geo, y_pred_geo, training_mask)
    assert jnp.allclose(out["reg_loss"], reg_ref, rtol=1e-4, atol=1e-4)
    assert jnp.allclose(out["cls_loss"], cls_ref, rtol=1e-4, atol=1e-4)
    assert jnp.allclose(out["angle_loss"], ang_ref, rtol=1e-4, atol=1e-4)

    print("KERNEL_OK")
</pallas_src>

<mosaic_0001>
module attributes {stable_mosaic.version = 11 : i64} {
  func.func @kernel(%arg0: i32, %arg1: i32, %arg2: memref<1x2x128xf32, #tpu.memory_space<vmem>>, %arg3: memref<1x2x128xf32, #tpu.memory_space<vmem>>, %arg4: memref<1x2x128xf32, #tpu.memory_space<vmem>>, %arg5: memref<1x5x2x128xf32, #tpu.memory_space<vmem>>, %arg6: memref<1x5x2x128xf32, #tpu.memory_space<vmem>>, %arg7: memref<1x1x8x128xf32, #tpu.memory_space<vmem>>) attributes {dimension_semantics = [#tpu.dimension_semantics<parallel>, #tpu.dimension_semantics<parallel>], iteration_bounds = array<i64: 2, 1>, scalar_prefetch = 0 : i64, scratch_operands = 0 : i64, tpu.core_type = #tpu.core_type<tc>, window_params = [{transform_indices = @transform_0, window_bounds = array<i64: 1, 2, 128>}, {transform_indices = @transform_1, window_bounds = array<i64: 1, 2, 128>}, {transform_indices = @transform_2, window_bounds = array<i64: 1, 2, 128>}, {transform_indices = @transform_3, window_bounds = array<i64: 1, 5, 2, 128>}, {transform_indices = @transform_4, window_bounds = array<i64: 1, 5, 2, 128>}, {transform_indices = @transform_5, window_bounds = array<i64: 1, 1, 8, 128>}]} {
    %c0 = arith.constant 0 : index
    %c0_0 = arith.constant 0 : index
    %c0_1 = arith.constant 0 : index
    %0 = vector.load %arg2[%c0, %c0_0, %c0_1] : memref<1x2x128xf32, #tpu.memory_space<vmem>>, vector<1x2x128xf32>
    %1 = vector.shape_cast %0 : vector<1x2x128xf32> to vector<2x128xf32>
    %c0_2 = arith.constant 0 : index
    %c0_3 = arith.constant 0 : index
    %c0_4 = arith.constant 0 : index
    %2 = vector.load %arg3[%c0_2, %c0_3, %c0_4] : memref<1x2x128xf32, #tpu.memory_space<vmem>>, vector<1x2x128xf32>
    %3 = vector.shape_cast %2 : vector<1x2x128xf32> to vector<2x128xf32>
    %c0_5 = arith.constant 0 : index
    %c0_6 = arith.constant 0 : index
    %c0_7 = arith.constant 0 : index
    %4 = vector.load %arg4[%c0_5, %c0_6, %c0_7] : memref<1x2x128xf32, #tpu.memory_space<vmem>>, vector<1x2x128xf32>
    %5 = vector.shape_cast %4 : vector<1x2x128xf32> to vector<2x128xf32>
    %cst = arith.constant 1.000000e+00 : f32
    %6 = vector.broadcast %cst : f32 to vector<2x128xf32>
    %7 = arith.subf %6, %5 : vector<2x128xf32>
    %8 = arith.mulf %3, %7 : vector<2x128xf32>
    %c0_8 = arith.constant 0 : index
    %c0_9 = arith.constant 0 : index
    %c0_10 = arith.constant 0 : index
    %c0_11 = arith.constant 0 : index
    %9 = vector.load %arg5[%c0_8, %c0_9, %c0_10, %c0_11] : memref<1x5x2x128xf32, #tpu.memory_space<vmem>>, vector<1x1x2x128xf32>
    %10 = vector.shape_cast %9 : vector<1x1x2x128xf32> to vector<2x128xf32>
    %c0_12 = arith.constant 0 : index
    %c1 = arith.constant 1 : index
    %c0_13 = arith.constant 0 : index
    %c0_14 = arith.constant 0 : index
    %11 = vector.load %arg5[%c0_12, %c1, %c0_13, %c0_14] : memref<1x5x2x128xf32, #tpu.memory_space<vmem>>, vector<1x1x2x128xf32>
    %12 = vector.shape_cast %11 : vector<1x1x2x128xf32> to vector<2x128xf32>
    %c0_15 = arith.constant 0 : index
    %c2 = arith.constant 2 : index
    %c0_16 = arith.constant 0 : index
    %c0_17 = arith.constant 0 : index
    %13 = vector.load %arg5[%c0_15, %c2, %c0_16, %c0_17] : memref<1x5x2x128xf32, #tpu.memory_space<vmem>>, vector<1x1x2x128xf32>
    %14 = vector.shape_cast %13 : vector<1x1x2x128xf32> to vector<2x128xf32>
    %c0_18 = arith.constant 0 : index
    %c3 = arith.constant 3 : index
    %c0_19 = arith.constant 0 : index
    %c0_20 = arith.constant 0 : index
    %15 = vector.load %arg5[%c0_18, %c3, %c0_19, %c0_20] : memref<1x5x2x128xf32, #tpu.memory_space<vmem>>, vector<1x1x2x128xf32>
    %16 = vector.shape_cast %15 : vector<1x1x2x128xf32> to vector<2x128xf32>
    %c0_21 = arith.constant 0 : index
    %c4 = arith.constant 4 : index
    %c0_22 = arith.constant 0 : index
    %c0_23 = arith.constant 0 : index
    %17 = vector.load %arg5[%c0_21, %c4, %c0_22, %c0_23] : memref<1x5x2x128xf32, #tpu.memory_space<vmem>>, vector<1x1x2x128xf32>
    %18 = vector.shape_cast %17 : vector<1x1x2x128xf32> to vector<2x128xf32>
    %c0_24 = arith.constant 0 : index
    %c0_25 = arith.constant 0 : index
    %c0_26 = arith.constant 0 : index
    %c0_27 = arith.constant 0 : index
    %19 = vector.load %arg6[%c0_24, %c0_25, %c0_26, %c0_27] : memref<1x5x2x128xf32, #tpu.memory_space<vmem>>, vector<1x1x2x128xf32>
    %20 = vector.shape_cast %19 : vector<1x1x2x128xf32> to vector<2x128xf32>
    %c0_28 = arith.constant 0 : index
    %c1_29 = arith.constant 1 : index
    %c0_30 = arith.constant 0 : index
    %c0_31 = arith.constant 0 : index
    %21 = vector.load %arg6[%c0_28, %c1_29, %c0_30, %c0_31] : memref<1x5x2x128xf32, #tpu.memory_space<vmem>>, vector<1x1x2x128xf32>
    %22 = vector.shape_cast %21 : vector<1x1x2x128xf32> to vector<2x128xf32>
    %c0_32 = arith.constant 0 : index
    %c2_33 = arith.constant 2 : index
    %c0_34 = arith.constant 0 : index
    %c0_35 = arith.constant 0 : index
    %23 = vector.load %arg6[%c0_32, %c2_33, %c0_34, %c0_35] : memref<1x5x2x128xf32, #tpu.memory_space<vmem>>, vector<1x1x2x128xf32>
    %24 = vector.shape_cast %23 : vector<1x1x2x128xf32> to vector<2x128xf32>
    %c0_36 = arith.constant 0 : index
    %c3_37 = arith.constant 3 : index
    %c0_38 = arith.constant 0 : index
    %c0_39 = arith.constant 0 : index
    %25 = vector.load %arg6[%c0_36, %c3_37, %c0_38, %c0_39] : memref<1x5x2x128xf32, #tpu.memory_space<vmem>>, vector<1x1x2x128xf32>
    %26 = vector.shape_cast %25 : vector<1x1x2x128xf32> to vector<2x128xf32>
    %c0_40 = arith.constant 0 : index
    %c4_41 = arith.constant 4 : index
    %c0_42 = arith.constant 0 : index
    %c0_43 = arith.constant 0 : index
    %27 = vector.load %arg6[%c0_40, %c4_41, %c0_42, %c0_43] : memref<1x5x2x128xf32, #tpu.memory_space<vmem>>, vector<1x1x2x128xf32>
    %28 = vector.shape_cast %27 : vector<1x1x2x128xf32> to vector<2x128xf32>
    %29 = arith.addf %10, %12 : vector<2x128xf32>
    %30 = arith.addf %14, %16 : vector<2x128xf32>
    %31 = arith.mulf %29, %30 : vector<2x128xf32>
    %32 = arith.addf %20, %22 : vector<2x128xf32>
    %33 = arith.addf %24, %26 : vector<2x128xf32>
    %34 = arith.mulf %32, %33 : vector<2x128xf32>
    %35 = arith.minimumf %14, %24 : vector<2x128xf32>
    %36 = arith.minimumf %16, %26 : vector<2x128xf32>
    %37 = arith.addf %35, %36 : vector<2x128xf32>
    %38 = arith.minimumf %10, %20 : vector<2x128xf32>
    %39 = arith.minimumf %12, %22 : vector<2x128xf32>
    %40 = arith.addf %38, %39 : vector<2x128xf32>
    %41 = arith.mulf %37, %40 : vector<2x128xf32>
    %42 = arith.subf %31, %41 : vector<2x128xf32>
    %43 = arith.addf %42, %34 : vector<2x128xf32>
    %cst_44 = arith.constant 1.000000e+00 : f32
    %44 = vector.broadcast %cst_44 : f32 to vector<2x128xf32>
    %45 = arith.addf %43, %44 : vector<2x128xf32>
    %46 = math.log %45 : vector<2x128xf32>
    %cst_45 = arith.constant 1.000000e+00 : f32
    %47 = vector.broadcast %cst_45 : f32 to vector<2x128xf32>
    %48 = arith.addf %41, %47 : vector<2x128xf32>
    %49 = math.log %48 : vector<2x128xf32>
    %50 = arith.subf %46, %49 : vector<2x128xf32>
    %51 = arith.subf %28, %18 : vector<2x128xf32>
    %52 = math.cos %51 : vector<2x128xf32>
    %cst_46 = arith.constant 1.000000e+00 : f32
    %53 = vector.broadcast %cst_46 : f32 to vector<2x128xf32>
    %54 = arith.subf %53, %52 : vector<2x128xf32>
    %cst_47 = arith.constant dense<0.000000e+00> : vector<128xf32>
    %55 = vector.multi_reduction <add>, %1, %cst_47 [0] : vector<2x128xf32> to vector<128xf32>
    %56 = vector.shape_cast %55 : vector<128xf32> to vector<1x128xf32>
    %57 = arith.mulf %1, %8 : vector<2x128xf32>
    %cst_48 = arith.constant dense<0.000000e+00> : vector<128xf32>
    %58 = vector.multi_reduction <add>, %57, %cst_48 [0] : vector<2x128xf32> to vector<128xf32>
    %59 = vector.shape_cast %58 : vector<128xf32> to vector<1x128xf32>
    %cst_49 = arith.constant dense<0.000000e+00> : vector<128xf32>
    %60 = vector.multi_reduction <add>, %8, %cst_49 [0] : vector<2x128xf32> to vector<128xf32>
    %61 = vector.shape_cast %60 : vector<128xf32> to vector<1x128xf32>
    %62 = arith.mulf %50, %1 : vector<2x128xf32>
    %cst_50 = arith.constant dense<0.000000e+00> : vector<128xf32>
    %63 = vector.multi_reduction <add>, %62, %cst_50 [0] : vector<2x128xf32> to vector<128xf32>
    %64 = vector.shape_cast %63 : vector<128xf32> to vector<1x128xf32>
    %65 = arith.mulf %54, %1 : vector<2x128xf32>
    %cst_51 = arith.constant dense<0.000000e+00> : vector<128xf32>
    %66 = vector.multi_reduction <add>, %65, %cst_51 [0] : vector<2x128xf32> to vector<128xf32>
    %67 = vector.shape_cast %66 : vector<128xf32> to vector<1x128xf32>
    %cst_52 = arith.constant 0.000000e+00 : f32
    %68 = vector.broadcast %cst_52 : f32 to vector<3x128xf32>
    %69 = tpu.concatenate %56, %59, %61, %64, %67, %68 in 0 : vector<1x128xf32>, vector<1x128xf32>, vector<1x128xf32>, vector<1x128xf32>, vector<1x128xf32>, vector<3x128xf32> -> vector<8x128xf32>
    %c0_53 = arith.constant 0 : index
    %c0_54 = arith.constant 0 : index
    %c0_55 = arith.constant 0 : index
    %c0_56 = arith.constant 0 : index
    %70 = vector.load %arg7[%c0_53, %c0_54, %c0_55, %c0_56] : memref<1x1x8x128xf32, #tpu.memory_space<vmem>>, vector<1x1x8x128xf32>
    %71 = vector.shape_cast %70 : vector<1x1x8x128xf32> to vector<8x128xf32>
    %72 = vector.shape_cast %69 : vector<8x128xf32> to vector<1x1x8x128xf32>
    tpu.vector_store %arg7[%c0_53, %c0_54, %c0_55, %c0_56], %72 {strides = array<i32>} : memref<1x1x8x128xf32, #tpu.memory_space<vmem>>, vector<1x1x8x128xf32>,
    return
  }
  func.func @transform_0(%arg0: i32, %arg1: i32) -> (i32, i32, i32) {
    %c0_i32 = arith.constant 0 : i32
    %c0_i32_0 = arith.constant 0 : i32
    return %arg0, %arg1, %c0_i32 : i32, i32, i32
  }
  func.func @transform_1(%arg0: i32, %arg1: i32) -> (i32, i32, i32) {
    %c0_i32 = arith.constant 0 : i32
    %c0_i32_0 = arith.constant 0 : i32
    return %arg0, %arg1, %c0_i32 : i32, i32, i32
  }
  func.func @transform_2(%arg0: i32, %arg1: i32) -> (i32, i32, i32) {
    %c0_i32 = arith.constant 0 : i32
    %c0_i32_0 = arith.constant 0 : i32
    return %arg0, %arg1, %c0_i32 : i32, i32, i32
  }
  func.func @transform_3(%arg0: i32, %arg1: i32) -> (i32, i32, i32, i32) {
    %c0_i32 = arith.constant 0 : i32
    %c0_i32_0 = arith.constant 0 : i32
    %c0_i32_1 = arith.constant 0 : i32
    return %arg0, %c0_i32, %arg1, %c0_i32_0 : i32, i32, i32, i32
  }
  func.func @transform_4(%arg0: i32, %arg1: i32) -> (i32, i32, i32, i32) {
    %c0_i32 = arith.constant 0 : i32
    %c0_i32_0 = arith.constant 0 : i32
    %c0_i32_1 = arith.constant 0 : i32
    return %arg0, %c0_i32, %arg1, %c0_i32_0 : i32, i32, i32, i32
  }
  func.func @transform_5(%arg0: i32, %arg1: i32) -> (i32, i32, i32, i32) {
    %c0_i32 = arith.constant 0 : i32
    %c0_i32_0 = arith.constant 0 : i32
    %c0_i32_1 = arith.constant 0 : i32
    return %arg0, %arg1, %c0_i32, %c0_i32_0 : i32, i32, i32, i32
  }
}

</mosaic_0001>

<bundles_post_ra>
// kernel: _detection_losses.1
= control target key start
LH: loop header
LB: loop body
LE: loop exit
PB: predicated region body
PF: predicated region fallthrough
CT: control target
= control target key end

     0   :  { %s836_s18 = smov 0   ;;  %s838_s19 = smov 0   ;;  %s945_s0 = inlined_call_operand.vmem [shape: f32[2,2,128], index: 0, kind: input, shape index: {}]   ;;  %s946_s1 = inlined_call_operand.vmem [shape: f32[2,2,128], index: 1, kind: input, shape index: {}]   ;;  %s947_s2 = inlined_call_operand.vmem [shape: f32[2,2,128], index: 2, kind: input, shape index: {}]   ;;  %s948_s3 = inlined_call_operand.vmem [shape: f32[2,5,2,128], index: 3, kind: input, shape index: {}]   ;;  %s949_s4 = inlined_call_operand.vmem [shape: f32[2,5,2,128], index: 4, kind: input, shape index: {}]   ;;  %s950_s5 = inlined_call_operand.vmem [shape: f32[2,1,8,128], index: 5, kind: output, shape index: {}]  }
   0x1   :  { %s840_s20 = smov 0  }
   0x2 LB: > { %s27_s21 = sadd.s32 1, %s794_s19  ;;  %p712_p0 = scmp.ge.s32.totalorder %s798_s20, 1  ;;  %s798_s20 = sphi %s840_s20, %s15_s20   ;;  %s794_s19 = sphi %s838_s19, %s954_s19   ;;  %s790_s18 = sphi %s836_s18, %s953_s18  }
   0x3   : > { %p29_p1 = scmp.ge.s32.totalorder %s27_s21, 2  ;;  %p263_p2 = scmp.lt.s32.totalorder %s798_s20, 3 }
   0x5   : > { %s956_s21 = smov (%p29_p1, %s27_s21), 0  ;;  %p264_p3 = pnand %p712_p0, %p263_p2 }
   0x6   : > { %p325_p4 = scmp.lt.s32.totalorder (!%p264_p3), %s790_s18, 1  ;;  %v800_v16 = vmov (!%p264_p3), 683565275   ;;  %v801_v18 = vmov (!%p264_p3), 2475754826   ;;  %vm519_vm8 = vcmask (!%p264_p3), 1041408  }
   0x7   : > { %267 = sbr.rel (%p264_p3) target bundleno = 122 (0x7a), region = 40  ;;  %v802_v20 = vmov (!%p264_p3), 2131351028   ;;  %v803_v23 = vmov (!%p264_p3), 2102212464   ;;  %vm558_vm14 = vcmask (!%p264_p3), 1040384  }
   0x8   : > { %v804_v25 = vmov (!%p264_p3), 920167782   ;;  %v805_v34 = vmov (!%p264_p3), 1326507024   ;;  %vm561_vm15 = vcmask (!%p264_p3), 1042432  }
   0xe   : > { %s958_s18 = smov (!%p325_p4, %s790_s18), 1 }
   0xf   : > { %s733_s22 = smul.u32 10, %s958_s18  ;;  %s713_s29 = sshll.u32 %s958_s18, 1 }
  0x10   : > { %s345_s7 = scalar_lea.vmem %s947_s2, %s713_s29  ;;  %s338_s10 = scalar_lea.vmem %s946_s1, %s713_s29 }
  0x11   : > { %s860_s25 = scalar_lea.vmem %s948_s3, %s733_s22  ;;  %s865_s28 = scalar_lea.vmem %s949_s4, %s733_s22 }
  0x12   : > { %v722_v0 = vld [vmem:[%s860_s25 + $0x8] sm:$0x3]  ;;  %v374_v10 = vld [vmem:[%s860_s25] sm:$0x3]  ;;  %v719_v31 = vld [vmem:[%s860_s25 + $0x2] sm:$0x3]  ;;  %s331_s13 = scalar_lea.vmem %s945_s0, %s713_s29 }
  0x13   : > { %v726_v1 = vld [vmem:[%s865_s28 + $0x8] sm:$0x3]  ;;  %v877_v11 = vld [vmem:[%s865_s28] sm:$0x3]  ;;  %v720_v32 = vld [vmem:[%s860_s25 + $0x4] sm:$0x3] }
  0x14   : > { %v869_v2 = vsub.f32 %v726_v1, %v722_v0  ;;  %v401_v22 = vmin.f32 %v374_v10, %v877_v11  ;;  %v721_v37 = vld [vmem:[%s860_s25 + $0x6] sm:$0x3]  ;;  %v724_v38 = vld [vmem:[%s865_s28 + $0x4] sm:$0x3]  ;;  %v723_v42 = vld [vmem:[%s865_s28 + $0x2] sm:$0x3]  ;;  %v392_v1 = vadd.f32 %v719_v31, %v374_v10 }
  0x15   : > { %v725_v43 = vld [vmem:[%s865_s28 + $0x6] sm:$0x3]  ;;  %v398_v50 = vmin.f32 %v720_v32, %v724_v38  ;;  %v402_v55 = vmin.f32 %v719_v31, %v723_v42  ;;  %s718_s14 = sshll.u32 %s958_s18, 3 }
  0x16   : > { %v418_v3 = vand.u32 2139095040, %v869_v2  ;;  %v415_v5 = vand.u32 2147483647, %v869_v2  ;;  %v399_v54 = vmin.f32 %v721_v37, %v725_v43  ;;  %vm417_vm7 = vcmp.lt.s32.totalorder %v869_v2, 0  ;;  %s368_s17 = scalar_lea.vmem %s950_s5, %s718_s14 }
  0x17   : > { %vm507_vm13 = vweird.f32 %v869_v2 }
  0x18   : > { %v419_v4 = vshrl.u32 %v418_v3, 23  ;;  %v422_v8 = vand.u32 8388607, %v415_v5  ;;  %v393_v3 = vadd.f32 %v721_v37, %v720_v32  ;;  %v370_v37 = vld [vmem:[%s338_s10] sm:$0x3] }
  0x19   : > { %vm916_vm9 = vcmp.le.f32.partialorder %v415_v5, 0.7853982 }
  0x1a   : > { %v727_v6 = vadd.s32 4294967169, %v419_v4  ;;  %v423_v13 = vor.u32 8388608, %v422_v8  ;;  %v400_v4 = vadd.f32 %v399_v54, %v398_v50 }
  0x1c   : > { %v425_v7 = vadd.s32 1, %v727_v6  ;;  %v463_v36 = vshll.u32 %v423_v13, 8  ;;  %v403_v6 = vadd.f32 %v402_v55, %v401_v22  ;;  %v396_v13 = vadd.f32 %v725_v43, %v724_v38 }
  0x1e   : > { %vm426_vm0 = vcmp.gt.s32.totalorder %v425_v7, 0 }
  0x1f   : > { %v427_v9 = vsel %vm426_vm0, %v425_v7, 0  ;;  %vm563_vm0 = vcmask 1043456  }
  0x20   : > { %v429_v12 = vand.u32 31, %v427_v9  ;;  %v428_v14 = vshrl.u32 %v427_v9, 5  ;;  %v395_v9 = vadd.f32 %v723_v42, %v877_v11 }
  0x22   : > { %v430_v15 = vsub.s32 32, %v429_v12  ;;  %v432_v17 = vshll.u32 %v800_v16, %v429_v12  ;;  %v435_v19 = vshll.u32 %v801_v18, %v429_v12  ;;  %v438_v21 = vshll.u32 %v802_v20, %v429_v12 }
  0x23   : > { %v441_v24 = vshll.u32 %v803_v23, %v429_v12  ;;  %v444_v26 = vshll.u32 %v804_v25, %v429_v12  ;;  %vm447_vm1 = vcmp.lt.s32.totalorder %v428_v14, 1  ;;  %vm450_vm2 = vcmp.lt.s32.totalorder %v428_v14, 4 }
  0x24   : > { %v431_v27 = vshrl.u32 %v800_v16, %v430_v15  ;;  %v433_v28 = vshrl.u32 %v801_v18, %v430_v15  ;;  %v436_v29 = vshrl.u32 %v802_v20, %v430_v15  ;;  %v439_v30 = vshrl.u32 %v803_v23, %v430_v15 }
  0x25   : > { %v442_v33 = vshrl.u32 %v804_v25, %v430_v15  ;;  %v445_v35 = vshrl.u32 %v805_v34, %v430_v15  ;;  %vm448_vm3 = vcmp.lt.s32.totalorder %v428_v14, 2  ;;  %vm449_vm4 = vcmp.lt.s32.totalorder %v428_v14, 3 }
  0x26   : > { %v434_v39 = vor.u32 %v433_v28, %v432_v17  ;;  %v437_v40 = vor.u32 %v436_v29, %v435_v19  ;;  %v440_v41 = vor.u32 %v439_v30, %v438_v21  ;;  %v394_v12 = vmul.f32 %v393_v3, %v392_v1  ;;  %v371_v29 = vld [vmem:[%s345_s7] sm:$0x3] }
  0x27   : > { %v443_v44 = vor.u32 %v442_v33, %v441_v24  ;;  %v446_v45 = vor.u32 %v445_v35, %v444_v26  ;;  %v404_v14 = vmul.f32 %v403_v6, %v400_v4  ;;  %v397_v18 = vmul.f32 %v396_v13, %v395_v9 }
  0x28   : > { %v451_v46 = vsel %vm447_vm1, %v431_v27, %v434_v39  ;;  %v452_v47 = vsel %vm450_vm2, %v440_v41, 2102212464  ;;  %v455_v48 = vsel %vm447_vm1, %v434_v39, %v437_v40  ;;  %v459_v49 = vsel %vm447_vm1, %v437_v40, %v440_v41 }
  0x29   : > { %v453_v51 = vsel %vm449_vm4, %v437_v40, %v452_v47  ;;  %v456_v52 = vsel %vm450_vm2, %v443_v44, 920167782  ;;  %v460_v53 = vsel %vm450_vm2, %v446_v45, 1326507024  ;;  %v405_v10 = vsub.f32 %v394_v12, %v404_v14  ;;  %v369_v45 = vld [vmem:[%s331_s13] sm:$0x3] }
  0x2a   : > { %v457_v56 = vsel %vm449_vm4, %v440_v41, %v456_v52  ;;  %v461_v57 = vsel %vm449_vm4, %v443_v44, %v460_v53  ;;  %v454_v58 = vsel %vm448_vm3, %v451_v46, %v453_v51  ;;  %v410_v23 = vadd.f32 1.0, %v404_v14 }
  0x2b   : > { %v458_v59 = vsel %vm448_vm3, %v455_v48, %v457_v56  ;;  %v462_v60 = vsel %vm448_vm3, %v459_v49, %v461_v57  ;;  %v470_v7 = vmul.u32 %v463_v36, %v454_v58  ;;  %v406_v21 = vadd.f32 %v405_v10, %v397_v18 }
  0x2c   : > { %v892_v61 = vmul.u32.u64.low %v463_v36, %v462_v60  ;;  %v893_v62 = vmul.u32.u64.high %v463_v36, %v462_v60, %v892_v61  ;;  %v895_v63 = vmul.u32.u64.low %v463_v36, %v458_v59  ;;  %v896_v0 = vmul.u32.u64.high %v463_v36, %v458_v59, %v895_v63 }
  0x2d   : > { %v407_v25 = vadd.f32 1.0, %v406_v21  ;;  %768 = vlog2.f32 %v410_v23  ;;  %v372_v34 = vsub.f32 1.0, %v371_v29  ;;  %v520_v56 = vsel %vm519_vm8, %v369_v45, 0.0 }
  0x2e   : > { %vm472_vm5 = vc.u32 %v893_v62, %v895_v63  ;;  %v473_v8 = vadd.s32 1, %v896_v0  ;;  %v471_v28 = vadd.s32 %v895_v63, %v893_v62  ;;  %v521_v61 = vrot.slane %v520_v56, 4 }
  0x2f   : > { %770 = vlog2.f32 %v407_v25  ;;  %v373_v42 = vmul.f32 %v372_v34, %v370_v37  ;;  %vm565_vm1 = vcmask 1044480  }
  0x30   : > { %v474_v15 = vsel %vm472_vm5, %v473_v8, %v896_v0  ;;  %v522_v3 = vadd.f32 %v521_v61, %v520_v56 }
  0x31   : > { %v475_v16 = vadd.s32 %v474_v15, %v470_v7  ;;  %v527_v50 = vmul.f32 %v373_v42, %v369_v45  ;;  %v535_v62 = vsel %vm519_vm8, %v373_v42, 0.0 }
  0x32   : > { %v536_v0 = vrot.slane %v535_v62, 4  ;;  %v523_v9 = vrot.slane %v522_v3, 2 }
  0x33   : > { %v476_v17 = vadd.s32 536870912, %v475_v16  ;;  %v528_v57 = vsel %vm519_vm8, %v527_v50, 0.0 }
  0x34   : > { %v529_v5 = vrot.slane %v528_v57, 4  ;;  %v537_v8 = vadd.f32 %v536_v0, %v535_v62 }
  0x35   : > { %v477_v19 = vshrl.u32 %v476_v17, 30 }
  0x36   : > { %v530_v4 = vadd.f32 %v529_v5, %v528_v57  ;;  %v538_v18 = vrot.slane %v537_v8, 2 }
  0x37   : > { %v478_v20 = vshll.u32 %v477_v19, 30  ;;  %v769_v38 = vpop.eup %768  ;;  %v501_v54 = vsub.s32 4, %v477_v19 }
  0x38   : > { %v412_v47 = vmul.f32 0.6931472, %v769_v38  ;;  %v531_v12 = vrot.slane %v530_v4, 2  ;;  %v539_v25 = vadd.f32 %v538_v18, %v537_v8 }
  0x39   : > { %v479_v22 = vsub.s32 %v475_v16, %v478_v20  ;;  %v771_v41 = vpop.eup %770  ;;  %v502_v59 = vsel %vm417_vm7, %v501_v54, %v477_v19  ;;  %v524_v19 = vadd.f32 %v523_v9, %v522_v3 }
  0x3a   : > { %v409_v46 = vmul.f32 0.6931472, %v771_v41  ;;  %v504_v63 = vsel %vm916_vm9, 0, %v502_v59  ;;  %v532_v20 = vadd.f32 %v531_v12, %v530_v4 }
  0x3b   : > { %v481_v24 = vsub.s32 0, %v479_v22  ;;  %v508_v6 = vand.u32 3, %v504_v63 }
  0x3c   : > { %v413_v51 = vsub.f32 %v409_v46, %v412_v47 }
  0x3d   : > { %v728_v26 = vmin.u32 %v481_v24, %v479_v22  ;;  %vm513_vm10 = vcmp.eq.s32.totalorder %v508_v6, 2  ;;  %vm510_vm11 = vcmp.eq.s32.totalorder %v508_v6, 0  ;;  %vm509_vm12 = vcmp.lt.s32.totalorder %v508_v6, 2 }
  0x3e   : > { %v542_v60 = vmul.f32 %v413_v51, %v369_v45 }
  0x3f   : > { %v483_v11 = vclz %v728_v26 }
  0x40   : > { %v543_v1 = vsel %vm519_vm8, %v542_v60, 0.0 }
  0x41   : > { %v729_v27 = vadd.s32 4294967294, %v483_v11  ;;  %v544_v7 = vrot.slane %v543_v1, 4  ;;  %v525_v11 = vrot.slane %v524_v19, 1 }
  0x43   : > { %vm730_vm6 = vcmp.lt.s32.totalorder %v729_v27, 0  ;;  %v545_v16 = vadd.f32 %v544_v7, %v543_v1 }
  0x44   : > { %v486_v30 = vsel %vm730_vm6, 0, %v729_v27  ;;  %v533_v27 = vrot.slane %v532_v20, 1 }
  0x45   : > { %v487_v31 = vsub.s32 32, %v486_v30  ;;  %v488_v32 = vshll.u32 %v479_v22, %v486_v30  ;;  %v491_v33 = vsub.s32 4294967266, %v486_v30  ;;  %v546_v23 = vrot.slane %v545_v16, 2 }
  0x46   : > { %v540_v30 = vrot.slane %v539_v25, 1 }
  0x47   : > { %v489_v35 = vshrl.u32 %v471_v28, %v487_v31  ;;  %v492_v36 = vadd.s32 127, %v491_v33  ;;  %v547_v28 = vadd.f32 %v546_v23, %v545_v16  ;;  %v526_v31 = vadd.f32 %v525_v11, %v524_v19 }
  0x49   : > { %v490_v39 = vor.u32 %v489_v35, %v488_v32  ;;  %v493_v40 = vshll.u32 %v492_v36, 23  ;;  %v534_v32 = vadd.f32 %v533_v27, %v532_v20  ;;  %v548_v34 = vrot.slane %v547_v28, 1 }
  0x4a   : > { %v541_v35 = vadd.f32 %v540_v30, %v539_v25 }
  0x4b   : > { %v494_v43 = vor.u32 4788187, %v493_v40  ;;  %v497_v44 = vcvt.s32.f32 %v490_v39  ;;  %v559_v37 = vsel %vm558_vm14, %v526_v31, %v534_v32  ;;  %v549_v39 = vadd.f32 %v548_v34, %v547_v28 }
  0x4c   : > { %v560_v41 = vsel %vm519_vm8, %v559_v37, %v541_v35 }
  0x4d   : > { %v495_v48 = vand.u32 2147483647, %v494_v43  ;;  %v562_v43 = vsel %vm561_vm15, %v560_v41, %v549_v39 }
  0x4f   : > { %v498_v49 = vmul.f32 %v497_v44, %v495_v48 }
  0x51   : > { %v499_v53 = vxor.u32 2147483648, %v498_v49 }
  0x53   : > { %v500_v55 = vsel %vm417_vm7, %v499_v53, %v498_v49 }
  0x54   : > { %v503_v58 = vsel %vm916_vm9, %v869_v2, %v500_v55 }
  0x55   : > { %772 = vcosq.f32 %v503_v58 }
  0x56   : > { %774 = vsinq.f32 %v503_v58 }
  0x5f   : > { %v773_v13 = vpop.eup %772 }
  0x60   : > { %v775_v14 = vpop.eup %774  ;;  %v514_v15 = vxor.u32 2147483648, %v773_v13 }
  0x61   : > { %v511_v17 = vxor.u32 2147483648, %v775_v14 }
  0x62   : > { %v515_v10 = vsel %vm513_vm10, %v514_v15, %v775_v14 }
  0x63   : > { %v512_v21 = vsel %vm510_vm11, %v773_v13, %v511_v17 }
  0x64   : > { %v516_v22 = vsel %vm509_vm12, %v512_v21, %v515_v10 }
  0x65   : > { %v517_v24 = vsel %vm507_vm13, nan, %v516_v22 }
  0x66   : > { %v518_v26 = vsub.f32 1.0, %v517_v24 }
  0x68   : > { %v550_v29 = vmul.f32 %v518_v26, %v369_v45 }
  0x6a   : > { %v551_v33 = vsel %vm519_vm8, %v550_v29, 0.0 }
  0x6b   : > { %v552_v2 = vrot.slane %v551_v33, 4 }
  0x6d   : > { %v553_v36 = vadd.f32 %v552_v2, %v551_v33 }
  0x6f   : > { %v554_v38 = vrot.slane %v553_v36, 2 }
  0x71   : > { %v555_v40 = vadd.f32 %v554_v38, %v553_v36 }
  0x73   : > { %v556_v42 = vrot.slane %v555_v40, 1 }
  0x75   : > { %v557_v44 = vadd.f32 %v556_v42, %v555_v40 }
  0x77   : > { %v564_v45 = vsel %vm563_vm0, %v562_v43, %v557_v44 }
  0x78   : > { %v566_v46 = vsel %vm565_vm1, %v564_v45, 0.0 }
  0x79   : > { %567 = vst [vmem:[%s368_s17] sm:$0xff] %v566_v46 }
  0x7a PF: > { %s15_s20 = sadd.s32 1, %s798_s20   ;;  %s953_s18 = smov %s794_s19 }
  0x7b   : > { %p12_p5 = scmp.ge.s32.totalorder %s15_s20, 4   ;;  %s954_s19 = smov %s956_s21 }
  0x7d   :  { %14 = sbr.rel (!%p12_p5) target bundleno = 2 (0x2), region = 90 }

</bundles_post_ra>
